<compile_context>
chip_gen: v5e
topology: v5e:2x2
jax: 0.10.0
libtpu: 0.0.40
codegen_flags: <defaults>
</compile_context>

<pallas_src>
import functools
import math

import jax
import jax.numpy as jnp
import numpy as np
from jax.experimental import pallas as pl
from jax.experimental.pallas import tpu as pltpu


# --------------------------------------------------------------------------
# Pallas kernel: apply one composed 3x3 matrix to a (tm, 3*L) block, where
# each sensor row is laid out as [d0(L) | d1(L) | d2(L)] along the lanes.
# --------------------------------------------------------------------------
def _rotation_kernel(m_ref, x_ref, o_ref, *, seg_len):
    # m_ref : (9,) float32 in SMEM -- row-major composed 3x3 rotation matrix.
    # x_ref / o_ref : (tm, 3*seg_len) VMEM blocks (sensors on sublanes,
    #                 component-major segment samples on lanes).
    L = seg_len
    d0 = x_ref[:, 0:L]
    d1 = x_ref[:, L:2 * L]
    d2 = x_ref[:, 2 * L:3 * L]
    o_ref[:, 0:L]         = m_ref[0] * d0 + m_ref[1] * d1 + m_ref[2] * d2
    o_ref[:, L:2 * L]     = m_ref[3] * d0 + m_ref[4] * d1 + m_ref[5] * d2
    o_ref[:, 2 * L:3 * L] = m_ref[6] * d0 + m_ref[7] * d1 + m_ref[8] * d2


_BLOCK_BYTES_BUDGET = 2 * 1024 * 1024   # per-block VMEM budget (x4 in flight)


def _choose_tm(num_sensors, seg_len):
    """Sensors per block: full extent if it fits, else a multiple of 8."""
    row_bytes = 3 * seg_len * 4
    cap = _BLOCK_BYTES_BUDGET // max(row_bytes, 1)
    if cap >= num_sensors:
        return num_sensors
    return max(8, (cap // 8) * 8)


@jax.jit
def _apply_rotation(data, m_flat):
    """data: (num_sensors*3, L) float32, m_flat: (9,) float32 composed matrix."""
    C, L = data.shape
    S = C // 3
    # Free view: (S*3, L) -> (S, 3*L).  Same memory layout, no transpose.
    x = data.reshape(S, 3 * L)

    tm = _choose_tm(S, L)
    block_bytes = tm * 3 * L * 4
    params = {"dimension_semantics": ("parallel",)}
    vmem_needed = 4 * block_bytes + (1 << 20)
    if vmem_needed > 12 * 1024 * 1024:
        # Only triggered for very long segments (single 8-sensor block > 2 MiB).
        params["vmem_limit_bytes"] = min(vmem_needed, 40 * 1024 * 1024)

    kernel = functools.partial(_rotation_kernel, seg_len=L)
    out = pl.pallas_call(
        kernel,
        out_shape=jax.ShapeDtypeStruct((S, 3 * L), data.dtype),
        grid=(pl.cdiv(S, tm),),
        in_specs=[
            pl.BlockSpec(memory_space=pltpu.MemorySpace.SMEM),   # 3x3 matrix
            pl.BlockSpec((tm, 3 * L), lambda i: (i, 0)),         # sensor data
        ],
        out_specs=pl.BlockSpec((tm, 3 * L), lambda i: (i, 0)),
        compiler_params=pltpu.CompilerParams(**params),
    )(m_flat, x)
    return out.reshape(C, L)


class RandomRotationTransform:
    """JAX/Pallas port of the torch module.  Random decisions + matrix
    composition are host-side numpy glue; the per-sample elementwise rotation
    hot path runs in the Pallas kernel above."""

    def __init__(self, num_sensors, axs=("x", "y", "z"), r=None, p=0.5):
        self.num_sensors = num_sensors
        self.axs = [a.lower() for a in axs]
        if r is None:
            r = np.arange(0, 35, 5)
        self.r = np.asarray(r, dtype=np.float64) * math.pi / 180.0
        self.p = p

    # ------------------------------------------------------------------ host
    def sample_steps(self, rng):
        """Host-side numpy sampling (no device round trips); returns the list
        of (axis_char, angle) applications (empty if the p-branch misses).
        Mirrors the reference's nested axs_idx x r_idx loop."""
        steps = []
        if rng.random() < self.p:
            num_axs = int(rng.integers(0, len(self.axs))) + 1
            axs_idxs = rng.integers(0, len(self.axs), size=num_axs)
            r_idxs = rng.integers(0, len(self.r), size=num_axs)
            for a_idx in axs_idxs:
                for r_idx in r_idxs:
                    steps.append((self.axs[int(a_idx)], float(self.r[int(r_idx)])))
        return steps

    @staticmethod
    def _step_matrix(ax, ang):
        # Linear map equivalent to the reference's *in-place* update ordering
        # (the second updated row uses the already-updated first row).
        c, s = math.cos(ang), math.sin(ang)
        if ax == "x":    # d1' = c d1 - s d2 ; d2' = s d1' + c d2
            return np.array([[1.0, 0.0, 0.0],
                             [0.0, c, -s],
                             [0.0, c * s, c - s * s]], dtype=np.float64)
        if ax == "y":    # d0' = c d0 + s d2 ; d2' = c d2 - s d0'
            return np.array([[c, 0.0, s],
                             [0.0, 1.0, 0.0],
                             [-c * s, 0.0, c - s * s]], dtype=np.float64)
        # "z"            # d0' = c d0 - s d1 ; d1' = s d0' + c d1
        return np.array([[c, -s, 0.0],
                         [c * s, c - s * s, 0.0],
                         [0.0, 0.0, 1.0]], dtype=np.float64)

    def compose_matrix(self, steps):
        m = np.eye(3, dtype=np.float64)
        for ax, ang in steps:
            m = self._step_matrix(ax, ang) @ m
        return m.astype(np.float32)

    # ---------------------------------------------------------------- device
    def apply(self, data, steps):
        data = jnp.asarray(data, dtype=jnp.float32)
        if not steps:
            # Identity fast path: rotation branch not taken -> skip the kernel
            # entirely (JAX arrays are immutable, so returning the input is
            # equivalent to the reference's data.copy()).
            return data
        m_flat = jnp.asarray(self.compose_matrix(steps).reshape(9))
        return _apply_rotation(data, m_flat)

    def __call__(self, data, rng):
        # TODO(synk): the random branch/index draws stay on host (numpy); the
        # torch RNG stream itself has no meaningful Pallas equivalent.
        return self.apply(data, self.sample_steps(rng))


# --------------------------------------------------------------------------
# Pure-numpy reference with the original torch in-place update ordering.
# --------------------------------------------------------------------------
def _reference_numpy(data, num_sensors, steps):
    out = np.array(data, dtype=np.float32)
    for sen in range(num_sensors):
        blk = out[sen * 3:(sen + 1) * 3]          # view -> in-place semantics
        for ax, ang in steps:
            c = np.float32(math.cos(ang))
            s = np.float32(math.sin(ang))
            if ax == "x":
                blk[1] = blk[1] * c - blk[2] * s
                blk[2] = blk[1] * s + blk[2] * c
            elif ax == "y":
                blk[0] = blk[0] * c + blk[2] * s
                blk[2] = blk[2] * c - blk[0] * s
            else:
                blk[0] = blk[0] * c - blk[1] * s
                blk[1] = blk[0] * s + blk[1] * c
    return out


if __name__ == "__main__":
    num_sensors = 16
    seg_len = 256   # lane-friendly segment length

    # data structure: (axis, segment) = (num_sensors * 3, seg_len)
    data = jax.random.normal(jax.random.PRNGKey(0),
                             (num_sensors * 3, seg_len), dtype=jnp.float32)

    # p=1.0 so the rotation branch is exercised in this demo run.
    transform = RandomRotationTransform(num_sensors=num_sensors, p=1.0)
    rng = np.random.default_rng(0)
    steps = transform.sample_steps(rng)

    out = jax.block_until_ready(transform.apply(data, steps))

    ref = _reference_numpy(np.asarray(data), num_sensors, steps)
    # Composed-matrix path reassociates float32 ops -> allow ~1e-5 slack.
    np.testing.assert_allclose(np.asarray(out), ref, rtol=1e-5, atol=1e-5)

    # Identity fast path (p miss): no kernel launch, data unchanged.
    out_id = jax.block_until_ready(
        RandomRotationTransform(num_sensors=num_sensors, p=0.0)(data, rng))
    np.testing.assert_allclose(np.asarray(out_id), np.asarray(data))

    print("KERNEL_OK")
</pallas_src>

<mosaic_0001>
module attributes {stable_mosaic.version = 11 : i64} {
  func.func @_rotation_kernel(%arg0: i32, %arg1: memref<9xf32, #tpu.memory_space<smem>>, %arg2: memref<16x768xf32, #tpu.memory_space<vmem>>, %arg3: memref<16x768xf32, #tpu.memory_space<vmem>>) attributes {dimension_semantics = [#tpu.dimension_semantics<parallel>], iteration_bounds = array<i64: 1>, scalar_prefetch = 0 : i64, scratch_operands = 0 : i64, tpu.core_type = #tpu.core_type<tc>, window_params = [{transform_indices = @transform_0, window_bounds = array<i64: 9>}, {transform_indices = @transform_1, window_bounds = array<i64: 16, 768>}, {transform_indices = @transform_2, window_bounds = array<i64: 16, 768>}]} {
    %c0 = arith.constant 0 : index
    %c0_0 = arith.constant 0 : index
    %0 = vector.load %arg2[%c0, %c0_0] : memref<16x768xf32, #tpu.memory_space<vmem>>, vector<16x256xf32>
    %c0_1 = arith.constant 0 : index
    %c256 = arith.constant 256 : index
    %1 = vector.load %arg2[%c0_1, %c256] : memref<16x768xf32, #tpu.memory_space<vmem>>, vector<16x256xf32>
    %c0_2 = arith.constant 0 : index
    %c512 = arith.constant 512 : index
    %2 = vector.load %arg2[%c0_2, %c512] : memref<16x768xf32, #tpu.memory_space<vmem>>, vector<16x256xf32>
    %c0_3 = arith.constant 0 : index
    %3 = memref.load %arg1[%c0_3] : memref<9xf32, #tpu.memory_space<smem>>
    %4 = vector.broadcast %3 : f32 to vector<16x256xf32>
    %5 = arith.mulf %4, %0 : vector<16x256xf32>
    %c1 = arith.constant 1 : index
    %6 = memref.load %arg1[%c1] : memref<9xf32, #tpu.memory_space<smem>>
    %7 = vector.broadcast %6 : f32 to vector<16x256xf32>
    %8 = arith.mulf %7, %1 : vector<16x256xf32>
    %9 = arith.addf %5, %8 : vector<16x256xf32>
    %c2 = arith.constant 2 : index
    %10 = memref.load %arg1[%c2] : memref<9xf32, #tpu.memory_space<smem>>
    %11 = vector.broadcast %10 : f32 to vector<16x256xf32>
    %12 = arith.mulf %11, %2 : vector<16x256xf32>
    %13 = arith.addf %9, %12 : vector<16x256xf32>
    %c0_4 = arith.constant 0 : index
    %c0_5 = arith.constant 0 : index
    %14 = vector.load %arg3[%c0_4, %c0_5] : memref<16x768xf32, #tpu.memory_space<vmem>>, vector<16x256xf32>
    tpu.vector_store %arg3[%c0_4, %c0_5], %13 {strides = array<i32>} : memref<16x768xf32, #tpu.memory_space<vmem>>, vector<16x256xf32>,
    %c3 = arith.constant 3 : index
    %15 = memref.load %arg1[%c3] : memref<9xf32, #tpu.memory_space<smem>>
    %16 = vector.broadcast %15 : f32 to vector<16x256xf32>
    %17 = arith.mulf %16, %0 : vector<16x256xf32>
    %c4 = arith.constant 4 : index
    %18 = memref.load %arg1[%c4] : memref<9xf32, #tpu.memory_space<smem>>
    %19 = vector.broadcast %18 : f32 to vector<16x256xf32>
    %20 = arith.mulf %19, %1 : vector<16x256xf32>
    %21 = arith.addf %17, %20 : vector<16x256xf32>
    %c5 = arith.constant 5 : index
    %22 = memref.load %arg1[%c5] : memref<9xf32, #tpu.memory_space<smem>>
    %23 = vector.broadcast %22 : f32 to vector<16x256xf32>
    %24 = arith.mulf %23, %2 : vector<16x256xf32>
    %25 = arith.addf %21, %24 : vector<16x256xf32>
    %c0_6 = arith.constant 0 : index
    %c256_7 = arith.constant 256 : index
    %26 = vector.load %arg3[%c0_6, %c256_7] : memref<16x768xf32, #tpu.memory_space<vmem>>, vector<16x256xf32>
    tpu.vector_store %arg3[%c0_6, %c256_7], %25 {strides = array<i32>} : memref<16x768xf32, #tpu.memory_space<vmem>>, vector<16x256xf32>,
    %c6 = arith.constant 6 : index
    %27 = memref.load %arg1[%c6] : memref<9xf32, #tpu.memory_space<smem>>
    %28 = vector.broadcast %27 : f32 to vector<16x256xf32>
    %29 = arith.mulf %28, %0 : vector<16x256xf32>
    %c7 = arith.constant 7 : index
    %30 = memref.load %arg1[%c7] : memref<9xf32, #tpu.memory_space<smem>>
    %31 = vector.broadcast %30 : f32 to vector<16x256xf32>
    %32 = arith.mulf %31, %1 : vector<16x256xf32>
    %33 = arith.addf %29, %32 : vector<16x256xf32>
    %c8 = arith.constant 8 : index
    %34 = memref.load %arg1[%c8] : memref<9xf32, #tpu.memory_space<smem>>
    %35 = vector.broadcast %34 : f32 to vector<16x256xf32>
    %36 = arith.mulf %35, %2 : vector<16x256xf32>
    %37 = arith.addf %33, %36 : vector<16x256xf32>
    %c0_8 = arith.constant 0 : index
    %c512_9 = arith.constant 512 : index
    %38 = vector.load %arg3[%c0_8, %c512_9] : memref<16x768xf32, #tpu.memory_space<vmem>>, vector<16x256xf32>
    tpu.vector_store %arg3[%c0_8, %c512_9], %37 {strides = array<i32>} : memref<16x768xf32, #tpu.memory_space<vmem>>, vector<16x256xf32>,
    return
  }
  func.func @transform_0(%arg0: i32) -> i32 {
    %c0_i32 = arith.constant 0 : i32
    %c0_i32_0 = arith.constant 0 : i32
    return %c0_i32 : i32
  }
  func.func @transform_1(%arg0: i32) -> (i32, i32) {
    %c0_i32 = arith.constant 0 : i32
    %c0_i32_0 = arith.constant 0 : i32
    return %arg0, %c0_i32 : i32, i32
  }
  func.func @transform_2(%arg0: i32) -> (i32, i32) {
    %c0_i32 = arith.constant 0 : i32
    %c0_i32_0 = arith.constant 0 : i32
    return %arg0, %c0_i32 : i32, i32
  }
}

</mosaic_0001>

<bundles_post_ra>
// kernel: _apply_rotation.1
= control target key start
LH: loop header
LB: loop body
LE: loop exit
PB: predicated region body
PF: predicated region fallthrough
CT: control target
= control target key end

     0   :  { %7 = vsyncpa [#allocation3], 0  ;;  %s154_s12 = smov [#allocation2]   ;;  %s320_s0 = inlined_call_operand.vmem [shape: f32[9], index: 0, kind: input, shape index: {}]   ;;  %s321_s1 = inlined_call_operand.vmem [shape: f32[16,768], index: 1, kind: input, shape index: {}]   ;;  %s322_s2 = inlined_call_operand.vmem [shape: f32[16,768], index: 2, kind: output, shape index: {}]  }
   0x1   :  { %s13_s11 = sshll.u32 %s320_s0, 4  ;;  %s14_s11 = int_to_ptr.vmem [resolvable:$true] %s13_s11 }
   0x2   :  { %16 = dma.vmem_to_smem %s14_s11, 16, %s154_s12, [#allocation3]  }
   0x3   :  { %152 = dma.done.wait [#allocation3], 16  }
   0x4   :  { %153 = vsyncadd [#allocation3], 4294967280 }
   0x5   :  { %23 = sfence }
   0x6   :  { %s36_s13 = sld [smem:[#allocation2]]  ;;  %v176_v0 = vld [vmem:[%s321_s1] sm:$0xff]  ;;  %v183_v1 = vld [vmem:[%s321_s1 + $0x10] sm:$0xff]  ;;  %v188_v2 = vld [vmem:[%s321_s1 + $0x8] sm:$0xff] }
   0x7   :  { %s131_s14 = sld [smem:[#allocation2 + $0x1]]  ;;  %v193_v3 = vld [vmem:[%s321_s1 + $0x30] sm:$0xff]  ;;  %v200_v4 = vld [vmem:[%s321_s1 + $0x20] sm:$0xff]  ;;  %v205_v5 = vld [vmem:[%s321_s1 + $0x18] sm:$0xff] }
   0x8   :  { %s132_s15 = sld [smem:[#allocation2 + $0x2]]  ;;  %v210_v6 = vld [vmem:[%s321_s1 + $0x40] sm:$0xff]  ;;  %v215_v8 = vld [vmem:[%s321_s1 + $0x28] sm:$0xff]  ;;  %v220_v9 = vld [vmem:[%s321_s1 + $0x50] sm:$0xff] }
   0x9   :  { %s178_s18 = sld [smem:[#allocation2 + $0x3]]  ;;  %v225_v10 = vld [vmem:[%s321_s1 + $0x38] sm:$0xff]  ;;  %v233_v15 = vld [vmem:[%s321_s1 + $0x48] sm:$0xff] }
   0xa   :  { %s195_s24 = sld [smem:[#allocation2 + $0x4]]  ;;  %v241_v20 = vld [vmem:[%s321_s1 + $0x58] sm:$0xff] }
   0xb   :  { %s135_s3 = sld [smem:[#allocation2 + $0x5]] }
   0xc   :  { %v37_v7 = vstv %s36_s13  ;;  %s252_s16 = sld [smem:[#allocation2 + $0x8]] }
   0xd   :  { %v38_v11 = vmul.f32 %v37_v7, %v176_v0  ;;  %v43_v12 = vstv %s131_s14  ;;  %v39_v13 = vmul.f32 %v37_v7, %v188_v2  ;;  %v40_v14 = vmul.f32 %v37_v7, %v193_v3  ;;  %s243_s14 = sld [smem:[#allocation2 + $0x6]] }
   0xe   :  { %v44_v16 = vmul.f32 %v43_v12, %v183_v1  ;;  %v53_v17 = vstv %s132_s15  ;;  %v45_v18 = vmul.f32 %v43_v12, %v205_v5  ;;  %v46_v19 = vmul.f32 %v43_v12, %v210_v6  ;;  %s249_s15 = sld [smem:[#allocation2 + $0x7]] }
   0xf   :  { %v54_v21 = vmul.f32 %v53_v17, %v200_v4  ;;  %v55_v22 = vmul.f32 %v53_v17, %v215_v8  ;;  %v56_v23 = vmul.f32 %v53_v17, %v220_v9  ;;  %v41_v24 = vmul.f32 %v37_v7, %v225_v10 }
  0x10   :  { %v48_v25 = vadd.f32 %v44_v16, %v38_v11  ;;  %v49_v26 = vadd.f32 %v45_v18, %v39_v13  ;;  %v50_v27 = vadd.f32 %v46_v19, %v40_v14  ;;  %v47_v28 = vmul.f32 %v43_v12, %v233_v15 }
  0x11   :  { %v57_v29 = vmul.f32 %v53_v17, %v241_v20  ;;  %v67_v30 = vstv %s178_s18  ;;  %v73_v31 = vstv %s195_s24  ;;  %v83_v32 = vstv %s135_s3 }
  0x12   :  { %v58_v33 = vadd.f32 %v54_v21, %v48_v25  ;;  %v59_v34 = vadd.f32 %v55_v22, %v49_v26  ;;  %v60_v35 = vadd.f32 %v56_v23, %v50_v27  ;;  %v51_v36 = vadd.f32 %v47_v28, %v41_v24 }
  0x13   :  { %v68_v37 = vmul.f32 %v67_v30, %v176_v0  ;;  %v74_v38 = vmul.f32 %v73_v31, %v183_v1  ;;  %v84_v39 = vmul.f32 %v83_v32, %v200_v4  ;;  %v69_v40 = vmul.f32 %v67_v30, %v188_v2 }
  0x14   :  { %62 = vst [vmem:[%s322_s2] sm:$0xff] %v58_v33  ;;  %v61_v41 = vadd.f32 %v57_v29, %v51_v36  ;;  %v75_v42 = vmul.f32 %v73_v31, %v205_v5  ;;  %v85_v43 = vmul.f32 %v83_v32, %v215_v8  ;;  %v70_v44 = vmul.f32 %v67_v30, %v193_v3 }
  0x15   :  { %63 = vst [vmem:[%s322_s2 + $0x8] sm:$0xff] %v59_v34  ;;  %v78_v45 = vadd.f32 %v74_v38, %v68_v37  ;;  %v76_v46 = vmul.f32 %v73_v31, %v210_v6  ;;  %v86_v47 = vmul.f32 %v83_v32, %v220_v9  ;;  %v71_v48 = vmul.f32 %v67_v30, %v225_v10 }
  0x16   :  { %64 = vst [vmem:[%s322_s2 + $0x30] sm:$0xff] %v60_v35  ;;  %v79_v49 = vadd.f32 %v75_v42, %v69_v40  ;;  %v77_v50 = vmul.f32 %v73_v31, %v233_v15  ;;  %v87_v51 = vmul.f32 %v83_v32, %v241_v20  ;;  %v97_v52 = vstv %s243_s14 }
  0x17   :  { %65 = vst [vmem:[%s322_s2 + $0x38] sm:$0xff] %v61_v41  ;;  %v88_v53 = vadd.f32 %v84_v39, %v78_v45  ;;  %v80_v54 = vadd.f32 %v76_v46, %v70_v44  ;;  %v98_v55 = vmul.f32 %v97_v52, %v176_v0  ;;  %v103_v56 = vstv %s249_s15 }
  0x18   :  { %v89_v57 = vadd.f32 %v85_v43, %v79_v49  ;;  %v81_v58 = vadd.f32 %v77_v50, %v71_v48  ;;  %v104_v59 = vmul.f32 %v103_v56, %v183_v1  ;;  %v113_v60 = vstv %s252_s16 }
  0x19   :  { %92 = vst [vmem:[%s322_s2 + $0x10] sm:$0xff] %v88_v53  ;;  %v90_v61 = vadd.f32 %v86_v47, %v80_v54  ;;  %v114_v62 = vmul.f32 %v113_v60, %v200_v4  ;;  %v99_v63 = vmul.f32 %v97_v52, %v188_v2  ;;  %v105_v7 = vmul.f32 %v103_v56, %v205_v5 }
  0x1a   :  { %93 = vst [vmem:[%s322_s2 + $0x18] sm:$0xff] %v89_v57  ;;  %v91_v0 = vadd.f32 %v87_v51, %v81_v58  ;;  %v108_v11 = vadd.f32 %v104_v59, %v98_v55  ;;  %v115_v1 = vmul.f32 %v113_v60, %v215_v8  ;;  %v100_v12 = vmul.f32 %v97_v52, %v193_v3 }
  0x1b   :  { %94 = vst [vmem:[%s322_s2 + $0x40] sm:$0xff] %v90_v61  ;;  %v109_v13 = vadd.f32 %v105_v7, %v99_v63  ;;  %v106_v4 = vmul.f32 %v103_v56, %v210_v6  ;;  %v116_v2 = vmul.f32 %v113_v60, %v220_v9  ;;  %v101_v5 = vmul.f32 %v97_v52, %v225_v10 }
  0x1c   :  { %95 = vst [vmem:[%s322_s2 + $0x48] sm:$0xff] %v91_v0  ;;  %v118_v14 = vadd.f32 %v114_v62, %v108_v11  ;;  %v107_v8 = vmul.f32 %v103_v56, %v233_v15  ;;  %v117_v3 = vmul.f32 %v113_v60, %v241_v20 }
  0x1d   :  { %v119_v16 = vadd.f32 %v115_v1, %v109_v13  ;;  %v110_v17 = vadd.f32 %v106_v4, %v100_v12 }
  0x1e   :  { %122 = vst [vmem:[%s322_s2 + $0x20] sm:$0xff] %v118_v14  ;;  %v111_v6 = vadd.f32 %v107_v8, %v101_v5 }
  0x1f   :  { %123 = vst [vmem:[%s322_s2 + $0x28] sm:$0xff] %v119_v16  ;;  %v120_v9 = vadd.f32 %v116_v2, %v110_v17 }
  0x20   :  { %v121_v10 = vadd.f32 %v117_v3, %v111_v6 }
  0x21   :  { %124 = vst [vmem:[%s322_s2 + $0x50] sm:$0xff] %v120_v9 }
  0x22   :  { %125 = vst [vmem:[%s322_s2 + $0x58] sm:$0xff] %v121_v10 }
  0x23   :  { %130 = vsyncpa [#allocation3], 1 }

</bundles_post_ra>
